<compile_context>
chip_gen: v5e
topology: v5e:2x2
jax: 0.10.0
libtpu: 0.0.40
codegen_flags: <defaults>
</compile_context>

<pallas_src>
import jax
import jax.numpy as jnp
from jax.experimental import pallas as pl
from jax.experimental.pallas import tpu as pltpu

_SQRT_HALF = 0.7071067811865476


def _erf_approx(x):
    # Abramowitz & Stegun 7.1.26 polynomial erf, |err| <= 1.5e-7 (f32 epilogue).
    a1, a2, a3, a4, a5 = (0.254829592, -0.284496736, 1.421413741,
                          -1.453152027, 1.061405429)
    p = 0.3275911
    z = jnp.where(x < 0, -x, x)
    # Divide moved to the EUP slot. approx rcp error (~2^-12) is dominated by the bf16
    # rounding (~2^-9) applied to the GEGLU output before GEMM2 (tolerance re-checked).
    t = pl.reciprocal(1.0 + p * z, approx=True)
    poly = ((((a5 * t + a4) * t + a3) * t + a2) * t + a1) * t
    e = 1.0 - poly * jnp.exp(-z * z)
    return jnp.where(x < 0, -e, e)


def _gelu_exact(x):
    # Matches torch.nn.functional.gelu default (erf-based).
    return 0.5 * x * (1.0 + _erf_approx(x * _SQRT_HALF))


def _ffn_resident_kernel(x_ref, w1v_ref, w1g_ref, b1v_ref, b1g_ref,
                         w2_ref, b2_ref, o_ref):
    # x_ref: (tm, Dp) bf16; w1*: (Dp, Hp) bf16; b1*: (1, Hp) f32; w2: (Hp, Dp) bf16; b2: (1, Dp) f32
    x = x_ref[...]
    v = jnp.dot(x, w1v_ref[...], preferred_element_type=jnp.float32) + b1v_ref[...]
    g = jnp.dot(x, w1g_ref[...], preferred_element_type=jnp.float32) + b1g_ref[...]
    h = v * _gelu_exact(g)
    # TODO(synk): nn.Dropout has p=0.0 in this module -> identity; stochastic dropout
    # (pltpu.prng_*) not implemented.
    y = jnp.dot(h.astype(w2_ref.dtype), w2_ref[...],
                preferred_element_type=jnp.float32) + b2_ref[...]
    o_ref[...] = y.astype(o_ref.dtype)


def _ffn_tiled_kernel(x_ref, w1v_ref, w1g_ref, b1v_ref, b1g_ref,
                      w2_ref, b2_ref, o_ref, acc_ref):
    # Hp-tiled path: grid axis 1 walks Hp tiles (GEMM1-N == GEMM2-K); f32 accumulator in VMEM.
    hidx = pl.program_id(1)

    @pl.when(hidx == 0)
    def _():
        acc_ref[...] = jnp.zeros_like(acc_ref)

    x = x_ref[...]
    v = jnp.dot(x, w1v_ref[...], preferred_element_type=jnp.float32) + b1v_ref[...]
    g = jnp.dot(x, w1g_ref[...], preferred_element_type=jnp.float32) + b1g_ref[...]
    h = v * _gelu_exact(g)
    acc_ref[...] += jnp.dot(h.astype(w2_ref.dtype), w2_ref[...],
                            preferred_element_type=jnp.float32)

    @pl.when(hidx == pl.num_programs(1) - 1)
    def _():
        o_ref[...] = (acc_ref[...] + b2_ref[...]).astype(o_ref.dtype)


def _round_up(n, m):
    return (n + m - 1) // m * m


def _hw_params():
    """Generation-aware knobs: (vmem_limit_cap, default_block_m, lane_align, big_vmem)."""
    vmem_cap = 64 << 20           # conservative (v7x) if the query fails
    kind = ""
    try:
        vmem_cap = int(pltpu.get_tpu_info().vmem_capacity_bytes)
    except Exception:
        pass
    try:
        kind = jax.devices()[0].device_kind.lower()
    except Exception:
        pass
    big_vmem = vmem_cap >= (100 << 20)              # v5e/v6e: 128 MiB, v7x: 64 MiB
    vmem_limit_cap = (104 << 20) if big_vmem else (56 << 20)
    default_block_m = 512 if big_vmem else 256
    # v6e/v7x MXU passes are 256-wide; v5e (4x128x128) is already full at 128.
    lane_align = 128 if ("v5" in kind) else 256
    return vmem_limit_cap, default_block_m, lane_align, big_vmem


def feed_forward(x, w1, b1, w2, b2, *, block_m=None, force_tiled=False):
    """Fused FeedForward forward pass.

    x : [B, S, D]   (feature-last)
    w1: [D, 2H]     (in, out) layout — transposed vs torch Linear.weight
    b1: [2H]        (first H = GEGLU value half, last H = gate half, as torch chunk)
    w2: [H, D]      (in, out) layout
    b2: [D]
    """
    B, S, D = x.shape
    H = w1.shape[1] // 2
    M = B * S
    out_dtype = x.dtype
    cdt = jnp.bfloat16                      # MXU operand dtype (f32 operands ~3x slower)
    itm_out = jnp.dtype(out_dtype).itemsize

    vmem_cap, default_bm, lane_align, big_vmem = _hw_params()
    if block_m is None:
        block_m = default_bm

    def align_feat(n):
        a = lane_align if n > 128 else 128
        return _round_up(n, a)

    Dp = align_feat(D)
    Hp = align_feat(H)

    # M tiling: 16-row granularity (bf16 packed sublane tile is (16, 128)).
    tm = min(block_m, _round_up(M, 16))
    Mp = _round_up(M, tm)
    if (not big_vmem) and Mp // tm == 1 and Mp >= 32 and (Mp // 2) % 16 == 0:
        tm = Mp // 2        # >=2 grid steps so v7x's second TensorCore gets work
    # Path selection: resident bf16 weight slab vs Hp-tiled fallback.
    weight_bytes_1buf = 3 * Dp * Hp * 2
    use_tiled = force_tiled or (weight_bytes_1buf > int(0.7 * vmem_cap))

    if use_tiled:
        max_th = 512
        n_h = -(-Hp // max_th)
        th = _round_up(-(-Hp // n_h), 128)
        Hp = n_h * th
    else:
        # Shrink tm if the f32 (tm, Hp) temporaries + resident weights would overflow.
        while tm > 64 and (weight_bytes_1buf + 3 * tm * Hp * 4
                           + 2 * tm * Dp * (2 + itm_out)) > vmem_cap:
            tm = _round_up(tm // 2, 16)
        Mp = _round_up(M, tm)
    n_m = Mp // tm

    # --- Pad / cast parameters (hoist out of the per-call hot path in production).
    w1v, w1g = w1[:, :H], w1[:, H:]
    b1v, b1g = b1[:H], b1[H:]
    w1v_p = jnp.zeros((Dp, Hp), cdt).at[:D, :H].set(w1v.astype(cdt))
    w1g_p = jnp.zeros((Dp, Hp), cdt).at[:D, :H].set(w1g.astype(cdt))
    w2_p = jnp.zeros((Hp, Dp), cdt).at[:H, :D].set(w2.astype(cdt))
    b1v_p = jnp.zeros((1, Hp), jnp.float32).at[0, :H].set(b1v.astype(jnp.float32))
    b1g_p = jnp.zeros((1, Hp), jnp.float32).at[0, :H].set(b1g.astype(jnp.float32))
    b2_p = jnp.zeros((1, Dp), jnp.float32).at[0, :D].set(b2.astype(jnp.float32))

    # Activations: no pad copy when already tile-aligned; else fuse bf16 cast into the pad.
    x2d = x.reshape(M, D)
    if M == Mp and D == Dp:
        x_in = x2d.astype(cdt)
        pad_out = False
    else:
        x_in = jnp.zeros((Mp, Dp), cdt).at[:M, :D].set(x2d.astype(cdt))
        pad_out = True

    # VMEM limit: conservative (double-buffered) footprint estimate, capped per generation.
    if use_tiled:
        foot = (2 * 3 * Dp * th * 2                 # streamed weight tiles (bf16, 2-buffered)
                + 2 * tm * Dp * (2 + itm_out)       # x + out tiles (2-buffered)
                + tm * Dp * 4                       # f32 accumulator scratch
                + 3 * tm * th * 4)                  # f32 v/g/h temporaries
    else:
        foot = (2 * weight_bytes_1buf               # upper bound if fallback double-buffers
                + 2 * tm * Dp * (2 + itm_out)
                + 3 * tm * Hp * 4)
    vmem_limit = min(max(int(1.3 * foot) + (4 << 20), 16 << 20), vmem_cap)

    cost = pl.CostEstimate(
        flops=6 * M * D * H,                        # 2*M*D*2H (GEMM1) + 2*M*H*D (GEMM2)
        transcendentals=M * H,                      # one exp per GEGLU element
        bytes_accessed=M * D * (2 + itm_out) + 3 * D * H * 2 + (2 * H + D) * 4,
    )

    if use_tiled:
        grid_spec = pltpu.PrefetchScalarGridSpec(
            num_scalar_prefetch=0,
            grid=(n_m, Hp // th),
            in_specs=[
                pl.BlockSpec((tm, Dp), lambda i, h: (i, 0)),   # x (constant across h)
                pl.BlockSpec((Dp, th), lambda i, h: (0, h)),   # W1 value half, streamed over Hp
                pl.BlockSpec((Dp, th), lambda i, h: (0, h)),   # W1 gate half
                pl.BlockSpec((1, th), lambda i, h: (0, h)),    # b1 value half
                pl.BlockSpec((1, th), lambda i, h: (0, h)),    # b1 gate half
                pl.BlockSpec((th, Dp), lambda i, h: (h, 0)),   # W2, streamed over Hp
                pl.BlockSpec((1, Dp), lambda i, h: (0, 0)),    # b2 (added at finalize)
            ],
            out_specs=pl.BlockSpec((tm, Dp), lambda i, h: (i, 0)),
            scratch_shapes=[pltpu.VMEM((tm, Dp), jnp.float32)],
        )
        out = pl.pallas_call(
            _ffn_tiled_kernel,
            out_shape=jax.ShapeDtypeStruct((Mp, Dp), out_dtype),
            grid_spec=grid_spec,
            compiler_params=pltpu.CompilerParams(
                dimension_semantics=("parallel", "arbitrary"),
                vmem_limit_bytes=vmem_limit),
            cost_estimate=cost,
        )(x_in, w1v_p, w1g_p, b1v_p, b1g_p, w2_p, b2_p)
    else:
        def call_resident(single_buffer_weights):
            wmode = pl.Buffered(1) if single_buffer_weights else None

            def wspec(shape):
                if wmode is None:
                    return pl.BlockSpec(shape, lambda i: (0, 0))
                return pl.BlockSpec(shape, lambda i: (0, 0), pipeline_mode=wmode)

            grid_spec = pltpu.PrefetchScalarGridSpec(
                num_scalar_prefetch=0,
                grid=(n_m,),
                in_specs=[
                    pl.BlockSpec((tm, Dp), lambda i: (i, 0)),  # x: streamed over M
                    wspec((Dp, Hp)), wspec((Dp, Hp)),          # W1 halves: resident, 1-buffered
                    wspec((1, Hp)), wspec((1, Hp)),            # b1 halves
                    wspec((Hp, Dp)), wspec((1, Dp)),           # W2, b2
                ],
                out_specs=pl.BlockSpec((tm, Dp), lambda i: (i, 0)),
            )
            return pl.pallas_call(
                _ffn_resident_kernel,
                out_shape=jax.ShapeDtypeStruct((Mp, Dp), out_dtype),
                grid_spec=grid_spec,
                compiler_params=pltpu.CompilerParams(
                    dimension_semantics=("parallel",),
                    vmem_limit_bytes=vmem_limit),
                cost_estimate=cost,
            )(x_in, w1v_p, w1g_p, b1v_p, b1g_p, w2_p, b2_p)

        try:
            out = call_resident(True)    # single-buffer the constant-index operands
        except Exception:
            out = call_resident(False)   # fallback if Buffered(1) is not supported

    if pad_out:
        out = out[:M, :D]
    return out.reshape(B, S, D)


def _reference(x, w1, b1, w2, b2):
    """Mirrors the kernel numerics: bf16 MXU operands, f32 accumulation/epilogue."""
    f32 = jnp.float32
    hp = jax.lax.Precision.HIGHEST
    xq = x.astype(jnp.bfloat16).astype(f32)
    w1q = w1.astype(jnp.bfloat16).astype(f32)
    w2q = w2.astype(jnp.bfloat16).astype(f32)
    h = jnp.einsum("bsd,dk->bsk", xq, w1q, precision=hp) + b1.astype(f32)
    v, g = jnp.split(h, 2, axis=-1)
    geglu = (v * jax.nn.gelu(g, approximate=False)).astype(jnp.bfloat16).astype(f32)
    y = jnp.einsum("bsh,hd->bsd", geglu, w2q, precision=hp) + b2.astype(f32)
    return y.astype(x.dtype)


if __name__ == "__main__":
    B, S, D, mult = 2, 8, 32, 4
    H = D * mult
    key = jax.random.PRNGKey(0)
    kx, k1, kb1, k2, kb2 = jax.random.split(key, 5)

    x = jax.random.normal(kx, (B, S, D), dtype=jnp.float32)
    # Synthetic Linear parameters in (in, out) layout (transposed vs torch Linear.weight).
    w1 = jax.random.normal(k1, (D, 2 * H), dtype=jnp.float32) * (1.0 / jnp.sqrt(D))
    b1 = jax.random.normal(kb1, (2 * H,), dtype=jnp.float32) * 0.01
    w2 = jax.random.normal(k2, (H, D), dtype=jnp.float32) * (1.0 / jnp.sqrt(H))
    b2 = jax.random.normal(kb2, (D,), dtype=jnp.float32) * 0.01

    ref = _reference(x, w1, b1, w2, b2)

    out = feed_forward(x, w1, b1, w2, b2)                       # resident-weights path
    jax.block_until_ready(out)
    assert out.shape == ref.shape, "shape mismatch vs reference"
    assert jnp.allclose(out, ref, atol=5e-3, rtol=5e-3), "resident path mismatch vs reference"

    out_t = feed_forward(x, w1, b1, w2, b2, force_tiled=True)   # Hp-tiled fallback path
    jax.block_until_ready(out_t)
    assert out_t.shape == ref.shape, "shape mismatch vs reference (tiled)"
    assert jnp.allclose(out_t, ref, atol=5e-3, rtol=5e-3), "tiled path mismatch vs reference"

    print("KERNEL_OK")
</pallas_src>

<mosaic_0001>
module attributes {stable_mosaic.version = 11 : i64} {
  func.func @_ffn_resident_kernel(%arg0: i32, %arg1: memref<16x128xbf16, #tpu.memory_space<vmem>>, %arg2: memref<128x128xbf16, #tpu.memory_space<vmem>>, %arg3: memref<128x128xbf16, #tpu.memory_space<vmem>>, %arg4: memref<1x128xf32, #tpu.memory_space<vmem>>, %arg5: memref<1x128xf32, #tpu.memory_space<vmem>>, %arg6: memref<128x128xbf16, #tpu.memory_space<vmem>>, %arg7: memref<1x128xf32, #tpu.memory_space<vmem>>, %arg8: memref<16x128xf32, #tpu.memory_space<vmem>>) attributes {dimension_semantics = [#tpu.dimension_semantics<parallel>], iteration_bounds = array<i64: 1>, scalar_prefetch = 0 : i64, scratch_operands = 0 : i64, tpu.core_type = #tpu.core_type<tc>, window_params = [{transform_indices = @transform_0, window_bounds = array<i64: 16, 128>}, {pipeline_mode = #tpu.pipeline_mode<synchronous>, transform_indices = @transform_1, window_bounds = array<i64: 128, 128>}, {pipeline_mode = #tpu.pipeline_mode<synchronous>, transform_indices = @transform_2, window_bounds = array<i64: 128, 128>}, {pipeline_mode = #tpu.pipeline_mode<synchronous>, transform_indices = @transform_3, window_bounds = array<i64: 1, 128>}, {pipeline_mode = #tpu.pipeline_mode<synchronous>, transform_indices = @transform_4, window_bounds = array<i64: 1, 128>}, {pipeline_mode = #tpu.pipeline_mode<synchronous>, transform_indices = @transform_5, window_bounds = array<i64: 128, 128>}, {pipeline_mode = #tpu.pipeline_mode<synchronous>, transform_indices = @transform_6, window_bounds = array<i64: 1, 128>}, {transform_indices = @transform_7, window_bounds = array<i64: 16, 128>}]} {
    %c0 = arith.constant 0 : index
    %c0_0 = arith.constant 0 : index
    %0 = vector.load %arg1[%c0, %c0_0] : memref<16x128xbf16, #tpu.memory_space<vmem>>, vector<16x128xbf16>
    %c0_1 = arith.constant 0 : index
    %c0_2 = arith.constant 0 : index
    %1 = vector.load %arg2[%c0_1, %c0_2] : memref<128x128xbf16, #tpu.memory_space<vmem>>, vector<128x128xbf16>
    %cst = arith.constant dense<0.000000e+00> : vector<16x128xf32>
    %2 = tpu.matmul %0, %1, %cst {dimension_numbers = #tpu.dot_dimension_numbers<[1], [0], [0], [1], [0, 0, 1, 1], [], []>} : vector<16x128xbf16>, vector<128x128xbf16>, vector<16x128xf32> -> vector<16x128xf32>
    %c0_3 = arith.constant 0 : index
    %c0_4 = arith.constant 0 : index
    %3 = vector.load %arg4[%c0_3, %c0_4] : memref<1x128xf32, #tpu.memory_space<vmem>>, vector<1x128xf32>
    %4 = vector.broadcast %3 : vector<1x128xf32> to vector<16x128xf32>
    %5 = arith.addf %2, %4 : vector<16x128xf32>
    %c0_5 = arith.constant 0 : index
    %c0_6 = arith.constant 0 : index
    %6 = vector.load %arg3[%c0_5, %c0_6] : memref<128x128xbf16, #tpu.memory_space<vmem>>, vector<128x128xbf16>
    %cst_7 = arith.constant dense<0.000000e+00> : vector<16x128xf32>
    %7 = tpu.matmul %0, %6, %cst_7 {dimension_numbers = #tpu.dot_dimension_numbers<[1], [0], [0], [1], [0, 0, 1, 1], [], []>} : vector<16x128xbf16>, vector<128x128xbf16>, vector<16x128xf32> -> vector<16x128xf32>
    %c0_8 = arith.constant 0 : index
    %c0_9 = arith.constant 0 : index
    %8 = vector.load %arg5[%c0_8, %c0_9] : memref<1x128xf32, #tpu.memory_space<vmem>>, vector<1x128xf32>
    %9 = vector.broadcast %8 : vector<1x128xf32> to vector<16x128xf32>
    %10 = arith.addf %7, %9 : vector<16x128xf32>
    %cst_10 = arith.constant 5.000000e-01 : f32
    %11 = vector.broadcast %cst_10 : f32 to vector<16x128xf32>
    %12 = arith.mulf %11, %10 : vector<16x128xf32>
    %cst_11 = arith.constant 0.707106769 : f32
    %13 = vector.broadcast %cst_11 : f32 to vector<16x128xf32>
    %14 = arith.mulf %10, %13 : vector<16x128xf32>
    %cst_12 = arith.constant 0.000000e+00 : f32
    %15 = vector.broadcast %cst_12 : f32 to vector<16x128xf32>
    %16 = arith.cmpf olt, %14, %15 : vector<16x128xf32>
    %cst_13 = arith.constant 0.000000e+00 : f32
    %17 = vector.broadcast %cst_13 : f32 to vector<16x128xf32>
    %18 = arith.subf %17, %14 : vector<16x128xf32>
    %19 = arith.select %16, %18, %14 : vector<16x128xi1>, vector<16x128xf32>
    %cst_14 = arith.constant 0.327591091 : f32
    %20 = vector.broadcast %cst_14 : f32 to vector<16x128xf32>
    %21 = arith.mulf %20, %19 : vector<16x128xf32>
    %cst_15 = arith.constant 1.000000e+00 : f32
    %22 = vector.broadcast %cst_15 : f32 to vector<16x128xf32>
    %23 = arith.addf %22, %21 : vector<16x128xf32>
    %24 = tpu.reciprocal %23 {approx = true} : vector<16x128xf32> -> vector<16x128xf32>
    %cst_16 = arith.constant 1.06140542 : f32
    %25 = vector.broadcast %cst_16 : f32 to vector<16x128xf32>
    %26 = arith.mulf %25, %24 : vector<16x128xf32>
    %cst_17 = arith.constant -1.45315206 : f32
    %27 = vector.broadcast %cst_17 : f32 to vector<16x128xf32>
    %28 = arith.addf %26, %27 : vector<16x128xf32>
    %29 = arith.mulf %28, %24 : vector<16x128xf32>
    %cst_18 = arith.constant 1.42141378 : f32
    %30 = vector.broadcast %cst_18 : f32 to vector<16x128xf32>
    %31 = arith.addf %29, %30 : vector<16x128xf32>
    %32 = arith.mulf %31, %24 : vector<16x128xf32>
    %cst_19 = arith.constant -0.284496725 : f32
    %33 = vector.broadcast %cst_19 : f32 to vector<16x128xf32>
    %34 = arith.addf %32, %33 : vector<16x128xf32>
    %35 = arith.mulf %34, %24 : vector<16x128xf32>
    %cst_20 = arith.constant 0.254829586 : f32
    %36 = vector.broadcast %cst_20 : f32 to vector<16x128xf32>
    %37 = arith.addf %35, %36 : vector<16x128xf32>
    %38 = arith.mulf %37, %24 : vector<16x128xf32>
    %cst_21 = arith.constant 0.000000e+00 : f32
    %39 = vector.broadcast %cst_21 : f32 to vector<16x128xf32>
    %40 = arith.subf %39, %19 : vector<16x128xf32>
    %41 = arith.mulf %40, %19 : vector<16x128xf32>
    %42 = math.exp %41 : vector<16x128xf32>
    %43 = arith.mulf %38, %42 : vector<16x128xf32>
    %cst_22 = arith.constant 1.000000e+00 : f32
    %44 = vector.broadcast %cst_22 : f32 to vector<16x128xf32>
    %45 = arith.subf %44, %43 : vector<16x128xf32>
    %cst_23 = arith.constant 0.000000e+00 : f32
    %46 = vector.broadcast %cst_23 : f32 to vector<16x128xf32>
    %47 = arith.cmpf olt, %14, %46 : vector<16x128xf32>
    %cst_24 = arith.constant 0.000000e+00 : f32
    %48 = vector.broadcast %cst_24 : f32 to vector<16x128xf32>
    %49 = arith.subf %48, %45 : vector<16x128xf32>
    %50 = arith.select %47, %49, %45 : vector<16x128xi1>, vector<16x128xf32>
    %cst_25 = arith.constant 1.000000e+00 : f32
    %51 = vector.broadcast %cst_25 : f32 to vector<16x128xf32>
    %52 = arith.addf %51, %50 : vector<16x128xf32>
    %53 = arith.mulf %12, %52 : vector<16x128xf32>
    %54 = arith.mulf %5, %53 : vector<16x128xf32>
    %55 = arith.truncf %54 : vector<16x128xf32> to vector<16x128xbf16>
    %c0_26 = arith.constant 0 : index
    %c0_27 = arith.constant 0 : index
    %56 = vector.load %arg6[%c0_26, %c0_27] : memref<128x128xbf16, #tpu.memory_space<vmem>>, vector<128x128xbf16>
    %cst_28 = arith.constant dense<0.000000e+00> : vector<16x128xf32>
    %57 = tpu.matmul %55, %56, %cst_28 {dimension_numbers = #tpu.dot_dimension_numbers<[1], [0], [0], [1], [0, 0, 1, 1], [], []>} : vector<16x128xbf16>, vector<128x128xbf16>, vector<16x128xf32> -> vector<16x128xf32>
    %c0_29 = arith.constant 0 : index
    %c0_30 = arith.constant 0 : index
    %58 = vector.load %arg7[%c0_29, %c0_30] : memref<1x128xf32, #tpu.memory_space<vmem>>, vector<1x128xf32>
    %59 = vector.broadcast %58 : vector<1x128xf32> to vector<16x128xf32>
    %60 = arith.addf %57, %59 : vector<16x128xf32>
    %c0_31 = arith.constant 0 : index
    %c0_32 = arith.constant 0 : index
    %61 = vector.load %arg8[%c0_31, %c0_32] : memref<16x128xf32, #tpu.memory_space<vmem>>, vector<16x128xf32>
    tpu.vector_store %arg8[%c0_31, %c0_32], %60 {strides = array<i32>} : memref<16x128xf32, #tpu.memory_space<vmem>>, vector<16x128xf32>,
    return
  }
  func.func @transform_0(%arg0: i32) -> (i32, i32) {
    %c0_i32 = arith.constant 0 : i32
    %c0_i32_0 = arith.constant 0 : i32
    return %arg0, %c0_i32 : i32, i32
  }
  func.func @transform_1(%arg0: i32) -> (i32, i32) {
    %c0_i32 = arith.constant 0 : i32
    %c0_i32_0 = arith.constant 0 : i32
    %c0_i32_1 = arith.constant 0 : i32
    return %c0_i32, %c0_i32_0 : i32, i32
  }
  func.func @transform_2(%arg0: i32) -> (i32, i32) {
    %c0_i32 = arith.constant 0 : i32
    %c0_i32_0 = arith.constant 0 : i32
    %c0_i32_1 = arith.constant 0 : i32
    return %c0_i32, %c0_i32_0 : i32, i32
  }
  func.func @transform_3(%arg0: i32) -> (i32, i32) {
    %c0_i32 = arith.constant 0 : i32
    %c0_i32_0 = arith.constant 0 : i32
    %c0_i32_1 = arith.constant 0 : i32
    return %c0_i32, %c0_i32_0 : i32, i32
  }
  func.func @transform_4(%arg0: i32) -> (i32, i32) {
    %c0_i32 = arith.constant 0 : i32
    %c0_i32_0 = arith.constant 0 : i32
    %c0_i32_1 = arith.constant 0 : i32
    return %c0_i32, %c0_i32_0 : i32, i32
  }
  func.func @transform_5(%arg0: i32) -> (i32, i32) {
    %c0_i32 = arith.constant 0 : i32
    %c0_i32_0 = arith.constant 0 : i32
    %c0_i32_1 = arith.constant 0 : i32
    return %c0_i32, %c0_i32_0 : i32, i32
  }
  func.func @transform_6(%arg0: i32) -> (i32, i32) {
    %c0_i32 = arith.constant 0 : i32
    %c0_i32_0 = arith.constant 0 : i32
    %c0_i32_1 = arith.constant 0 : i32
    return %c0_i32, %c0_i32_0 : i32, i32
  }
  func.func @transform_7(%arg0: i32) -> (i32, i32) {
    %c0_i32 = arith.constant 0 : i32
    %c0_i32_0 = arith.constant 0 : i32
    return %arg0, %c0_i32 : i32, i32
  }
}

module attributes {stable_mosaic.version = 11 : i64} {
  func.func @_ffn_resident_kernel(%arg0: i32, %arg1: memref<16x128xbf16, #tpu.memory_space<vmem>>, %arg2: memref<128x128xbf16, #tpu.memory_space<vmem>>, %arg3: memref<128x128xbf16, #tpu.memory_space<vmem>>, %arg4: memref<1x128xf32, #tpu.memory_space<vmem>>, %arg5: memref<1x128xf32, #tpu.memory_space<vmem>>, %arg6: memref<128x128xbf16, #tpu.memory_space<vmem>>, %arg7: memref<1x128xf32, #tpu.memory_space<vmem>>, %arg8: memref<16x128xf32, #tpu.memory_space<vmem>>) attributes {dimension_semantics = [#tpu.dimension_semantics<parallel>], iteration_bounds = array<i64: 1>, scalar_prefetch = 0 : i64, scratch_operands = 0 : i64, tpu.core_type = #tpu.core_type<tc>, window_params = [{transform_indices = @transform_0, window_bounds = array<i64: 16, 128>}, {pipeline_mode = #tpu.pipeline_mode<synchronous>, transform_indices = @transform_1, window_bounds = array<i64: 128, 128>}, {pipeline_mode = #tpu.pipeline_mode<synchronous>, transform_indices = @transform_2, window_bounds = array<i64: 128, 128>}, {pipeline_mode = #tpu.pipeline_mode<synchronous>, transform_indices = @transform_3, window_bounds = array<i64: 1, 128>}, {pipeline_mode = #tpu.pipeline_mode<synchronous>, transform_indices = @transform_4, window_bounds = array<i64: 1, 128>}, {pipeline_mode = #tpu.pipeline_mode<synchronous>, transform_indices = @transform_5, window_bounds = array<i64: 128, 128>}, {pipeline_mode = #tpu.pipeline_mode<synchronous>, transform_indices = @transform_6, window_bounds = array<i64: 1, 128>}, {transform_indices = @transform_7, window_bounds = array<i64: 16, 128>}]} {
    %c0 = arith.constant 0 : index
    %c0_0 = arith.constant 0 : index
    %0 = vector.load %arg1[%c0, %c0_0] : memref<16x128xbf16, #tpu.memory_space<vmem>>, vector<16x128xbf16>
    %c0_1 = arith.constant 0 : index
    %c0_2 = arith.constant 0 : index
    %1 = vector.load %arg2[%c0_1, %c0_2] : memref<128x128xbf16, #tpu.memory_space<vmem>>, vector<128x128xbf16>
    %cst = arith.constant dense<0.000000e+00> : vector<16x128xf32>
    %2 = tpu.matmul %0, %1, %cst {dimension_numbers = #tpu.dot_dimension_numbers<[1], [0], [0], [1], [0, 0, 1, 1], [], []>} : vector<16x128xbf16>, vector<128x128xbf16>, vector<16x128xf32> -> vector<16x128xf32>
    %c0_3 = arith.constant 0 : index
    %c0_4 = arith.constant 0 : index
    %3 = vector.load %arg4[%c0_3, %c0_4] : memref<1x128xf32, #tpu.memory_space<vmem>>, vector<1x128xf32>
    %4 = vector.broadcast %3 : vector<1x128xf32> to vector<16x128xf32>
    %5 = arith.addf %2, %4 : vector<16x128xf32>
    %c0_5 = arith.constant 0 : index
    %c0_6 = arith.constant 0 : index
    %6 = vector.load %arg3[%c0_5, %c0_6] : memref<128x128xbf16, #tpu.memory_space<vmem>>, vector<128x128xbf16>
    %cst_7 = arith.constant dense<0.000000e+00> : vector<16x128xf32>
    %7 = tpu.matmul %0, %6, %cst_7 {dimension_numbers = #tpu.dot_dimension_numbers<[1], [0], [0], [1], [0, 0, 1, 1], [], []>} : vector<16x128xbf16>, vector<128x128xbf16>, vector<16x128xf32> -> vector<16x128xf32>
    %c0_8 = arith.constant 0 : index
    %c0_9 = arith.constant 0 : index
    %8 = vector.load %arg5[%c0_8, %c0_9] : memref<1x128xf32, #tpu.memory_space<vmem>>, vector<1x128xf32>
    %9 = vector.broadcast %8 : vector<1x128xf32> to vector<16x128xf32>
    %10 = arith.addf %7, %9 : vector<16x128xf32>
    %cst_10 = arith.constant 5.000000e-01 : f32
    %11 = vector.broadcast %cst_10 : f32 to vector<16x128xf32>
    %12 = arith.mulf %11, %10 : vector<16x128xf32>
    %cst_11 = arith.constant 0.707106769 : f32
    %13 = vector.broadcast %cst_11 : f32 to vector<16x128xf32>
    %14 = arith.mulf %10, %13 : vector<16x128xf32>
    %cst_12 = arith.constant 0.000000e+00 : f32
    %15 = vector.broadcast %cst_12 : f32 to vector<16x128xf32>
    %16 = arith.cmpf olt, %14, %15 : vector<16x128xf32>
    %cst_13 = arith.constant 0.000000e+00 : f32
    %17 = vector.broadcast %cst_13 : f32 to vector<16x128xf32>
    %18 = arith.subf %17, %14 : vector<16x128xf32>
    %19 = arith.select %16, %18, %14 : vector<16x128xi1>, vector<16x128xf32>
    %cst_14 = arith.constant 0.327591091 : f32
    %20 = vector.broadcast %cst_14 : f32 to vector<16x128xf32>
    %21 = arith.mulf %20, %19 : vector<16x128xf32>
    %cst_15 = arith.constant 1.000000e+00 : f32
    %22 = vector.broadcast %cst_15 : f32 to vector<16x128xf32>
    %23 = arith.addf %22, %21 : vector<16x128xf32>
    %24 = tpu.reciprocal %23 {approx = true} : vector<16x128xf32> -> vector<16x128xf32>
    %cst_16 = arith.constant 1.06140542 : f32
    %25 = vector.broadcast %cst_16 : f32 to vector<16x128xf32>
    %26 = arith.mulf %25, %24 : vector<16x128xf32>
    %cst_17 = arith.constant -1.45315206 : f32
    %27 = vector.broadcast %cst_17 : f32 to vector<16x128xf32>
    %28 = arith.addf %26, %27 : vector<16x128xf32>
    %29 = arith.mulf %28, %24 : vector<16x128xf32>
    %cst_18 = arith.constant 1.42141378 : f32
    %30 = vector.broadcast %cst_18 : f32 to vector<16x128xf32>
    %31 = arith.addf %29, %30 : vector<16x128xf32>
    %32 = arith.mulf %31, %24 : vector<16x128xf32>
    %cst_19 = arith.constant -0.284496725 : f32
    %33 = vector.broadcast %cst_19 : f32 to vector<16x128xf32>
    %34 = arith.addf %32, %33 : vector<16x128xf32>
    %35 = arith.mulf %34, %24 : vector<16x128xf32>
    %cst_20 = arith.constant 0.254829586 : f32
    %36 = vector.broadcast %cst_20 : f32 to vector<16x128xf32>
    %37 = arith.addf %35, %36 : vector<16x128xf32>
    %38 = arith.mulf %37, %24 : vector<16x128xf32>
    %cst_21 = arith.constant 0.000000e+00 : f32
    %39 = vector.broadcast %cst_21 : f32 to vector<16x128xf32>
    %40 = arith.subf %39, %19 : vector<16x128xf32>
    %41 = arith.mulf %40, %19 : vector<16x128xf32>
    %42 = math.exp %41 : vector<16x128xf32>
    %43 = arith.mulf %38, %42 : vector<16x128xf32>
    %cst_22 = arith.constant 1.000000e+00 : f32
    %44 = vector.broadcast %cst_22 : f32 to vector<16x128xf32>
    %45 = arith.subf %44, %43 : vector<16x128xf32>
    %cst_23 = arith.constant 0.000000e+00 : f32
    %46 = vector.broadcast %cst_23 : f32 to vector<16x128xf32>
    %47 = arith.cmpf olt, %14, %46 : vector<16x128xf32>
    %cst_24 = arith.constant 0.000000e+00 : f32
    %48 = vector.broadcast %cst_24 : f32 to vector<16x128xf32>
    %49 = arith.subf %48, %45 : vector<16x128xf32>
    %50 = arith.select %47, %49, %45 : vector<16x128xi1>, vector<16x128xf32>
    %cst_25 = arith.constant 1.000000e+00 : f32
    %51 = vector.broadcast %cst_25 : f32 to vector<16x128xf32>
    %52 = arith.addf %51, %50 : vector<16x128xf32>
    %53 = arith.mulf %12, %52 : vector<16x128xf32>
    %54 = arith.mulf %5, %53 : vector<16x128xf32>
    %55 = arith.truncf %54 : vector<16x128xf32> to vector<16x128xbf16>
    %c0_26 = arith.constant 0 : index
    %c0_27 = arith.constant 0 : index
    %56 = vector.load %arg6[%c0_26, %c0_27] : memref<128x128xbf16, #tpu.memory_space<vmem>>, vector<128x128xbf16>
    %cst_28 = arith.constant dense<0.000000e+00> : vector<16x128xf32>
    %57 = tpu.matmul %55, %56, %cst_28 {dimension_numbers = #tpu.dot_dimension_numbers<[1], [0], [0], [1], [0, 0, 1, 1], [], []>} : vector<16x128xbf16>, vector<128x128xbf16>, vector<16x128xf32> -> vector<16x128xf32>
    %c0_29 = arith.constant 0 : index
    %c0_30 = arith.constant 0 : index
    %58 = vector.load %arg7[%c0_29, %c0_30] : memref<1x128xf32, #tpu.memory_space<vmem>>, vector<1x128xf32>
    %59 = vector.broadcast %58 : vector<1x128xf32> to vector<16x128xf32>
    %60 = arith.addf %57, %59 : vector<16x128xf32>
    %c0_31 = arith.constant 0 : index
    %c0_32 = arith.constant 0 : index
    %61 = vector.load %arg8[%c0_31, %c0_32] : memref<16x128xf32, #tpu.memory_space<vmem>>, vector<16x128xf32>
    tpu.vector_store %arg8[%c0_31, %c0_32], %60 {strides = array<i32>} : memref<16x128xf32, #tpu.memory_space<vmem>>, vector<16x128xf32>,
    return
  }
  func.func @transform_0(%arg0: i32) -> (i32, i32) {
    %c0_i32 = arith.constant 0 : i32
    %c0_i32_0 = arith.constant 0 : i32
    return %arg0, %c0_i32 : i32, i32
  }
  func.func @transform_1(%arg0: i32) -> (i32, i32) {
    %c0_i32 = arith.constant 0 : i32
    %c0_i32_0 = arith.constant 0 : i32
    %c0_i32_1 = arith.constant 0 : i32
    return %c0_i32, %c0_i32_0 : i32, i32
  }
  func.func @transform_2(%arg0: i32) -> (i32, i32) {
    %c0_i32 = arith.constant 0 : i32
    %c0_i32_0 = arith.constant 0 : i32
    %c0_i32_1 = arith.constant 0 : i32
    return %c0_i32, %c0_i32_0 : i32, i32
  }
  func.func @transform_3(%arg0: i32) -> (i32, i32) {
    %c0_i32 = arith.constant 0 : i32
    %c0_i32_0 = arith.constant 0 : i32
    %c0_i32_1 = arith.constant 0 : i32
    return %c0_i32, %c0_i32_0 : i32, i32
  }
  func.func @transform_4(%arg0: i32) -> (i32, i32) {
    %c0_i32 = arith.constant 0 : i32
    %c0_i32_0 = arith.constant 0 : i32
    %c0_i32_1 = arith.constant 0 : i32
    return %c0_i32, %c0_i32_0 : i32, i32
  }
  func.func @transform_5(%arg0: i32) -> (i32, i32) {
    %c0_i32 = arith.constant 0 : i32
    %c0_i32_0 = arith.constant 0 : i32
    %c0_i32_1 = arith.constant 0 : i32
    return %c0_i32, %c0_i32_0 : i32, i32
  }
  func.func @transform_6(%arg0: i32) -> (i32, i32) {
    %c0_i32 = arith.constant 0 : i32
    %c0_i32_0 = arith.constant 0 : i32
    %c0_i32_1 = arith.constant 0 : i32
    return %c0_i32, %c0_i32_0 : i32, i32
  }
  func.func @transform_7(%arg0: i32) -> (i32, i32) {
    %c0_i32 = arith.constant 0 : i32
    %c0_i32_0 = arith.constant 0 : i32
    return %arg0, %c0_i32 : i32, i32
  }
}

</mosaic_0001>

<bundles_post_ra>
// kernel: tpu_custom_call.1
= control target key start
LH: loop header
LB: loop body
LE: loop exit
PB: predicated region body
PF: predicated region fallthrough
CT: control target
= control target key end

     0   :  { %12 = vsyncpa [#allocation3], 0  ;;  %s789_s0 = inlined_call_operand.hbm [shape: bf16[16,128], index: 0, kind: input, shape index: {}]   ;;  %s790_s1 = inlined_call_operand.hbm [shape: bf16[128,128], index: 1, kind: input, shape index: {}]   ;;  %s791_s2 = inlined_call_operand.hbm [shape: bf16[128,128], index: 2, kind: input, shape index: {}]   ;;  %s792_s3 = inlined_call_operand.vmem [shape: f32[1,128], index: 3, kind: input, shape index: {}]   ;;  %s793_s4 = inlined_call_operand.vmem [shape: f32[1,128], index: 4, kind: input, shape index: {}]   ;;  %s794_s5 = inlined_call_operand.hbm [shape: bf16[128,128], index: 5, kind: input, shape index: {}]   ;;  %s795_s6 = inlined_call_operand.vmem [shape: f32[1,128], index: 6, kind: input, shape index: {}]   ;;  %s796_s7 = inlined_call_operand.hbm [shape: f32[16,128], index: 7, kind: output, shape index: {}]  }
   0x1   :  { %13 = vsyncpa [#allocation6], 0 }
   0x2   :  { %14 = vsyncpa [#allocation9], 0 }
   0x3   :  { %15 = vsyncpa [#allocation4], 0  ;;  %s33_s26 = sshll.u32 %s790_s1, 4  ;;  %s697_s27 = smov [#allocation5]   ;;  %s34_s26 = int_to_ptr.hbm [resolvable:$true] %s33_s26 }
   0x4   :  { %s35_s28 = sshll.u32 %s697_s27, 4  ;;  %s20_s8 = sshll.u32 %s789_s0, 4  ;;  %s36_s28 = int_to_ptr.vmem [resolvable:$true] %s35_s28  ;;  %s21_s8 = int_to_ptr.hbm [resolvable:$true] %s20_s8 }
   0x5   :  { %s698_s9 = smov 64   ;;  %s699_s10 = smov 4  }
   0x6   :  { %41 = dma.hbm_to_vmem [thread:$0]  %s34_s26, 1024, %s36_s28, [#allocation6], %s698_s9, %s698_s9, %s699_s10  }
   0x7   :  { %s700_s11 = smov [#allocation2]   ;;  %s46_s15 = sshll.u32 %s791_s2, 4  ;;  %s47_s15 = int_to_ptr.hbm [resolvable:$true] %s46_s15 }
   0x8   :  { %s22_s12 = sshll.u32 %s700_s11, 4  ;;  %s63_s17 = sshll.u32 %s794_s5, 4  ;;  %s23_s12 = int_to_ptr.vmem [resolvable:$true] %s22_s12  ;;  %s64_s17 = int_to_ptr.hbm [resolvable:$true] %s63_s17 }
   0x9   :  { %28 = dma.hbm_to_vmem [thread:$0]  %s21_s8, 128, %s23_s12, [#allocation3], %s698_s9, %s698_s9, %s699_s10  }
   0xa   :  { %s701_s18 = smov [#allocation7]   ;;  %s702_s0 = smov [#allocation8]  }
   0xb   :  { %s48_s19 = sshll.u32 %s701_s18, 4  ;;  %s65_s20 = sshll.u32 %s702_s0, 4  ;;  %s49_s19 = int_to_ptr.vmem [resolvable:$true] %s48_s19  ;;  %s66_s20 = int_to_ptr.vmem [resolvable:$true] %s65_s20 }
   0xc   :  { %54 = dma.hbm_to_vmem [thread:$0]  %s47_s15, 1024, %s49_s19, [#allocation6], %s698_s9, %s698_s9, %s699_s10  }
   0xd   :  { %71 = dma.hbm_to_vmem [thread:$0]  %s64_s17, 1024, %s66_s20, [#allocation9], %s698_s9, %s698_s9, %s699_s10  }
   0xe   :  { %689 = dma.done.wait [#allocation3], 128  }
   0xf   :  { %690 = vsyncadd [#allocation3], 4294967168 }
  0x10   :  { %691 = dma.done.wait [#allocation6], 2048  }
  0x11   :  { %692 = vsyncadd [#allocation6], 4294965248 }
  0x12   :  { %693 = dma.done.wait [#allocation9], 1024  }
  0x13   :  { %694 = vsyncadd [#allocation9], 4294966272  ;;  %v540_v0 = vld [vmem:[#allocation7 + $0x38] sm:$0xff]  ;;  %v539_v1 = vld [vmem:[#allocation7 + $0x30] sm:$0xff]  ;;  %s703_s23 = smov [#allocation10]   ;;  %s409_s27 = sshll.u32 %s796_s7, 4  ;;  %s410_s27 = int_to_ptr.hbm [resolvable:$true] %s409_s27 }
  0x14   :  { %248 = vmatpush.bf16.msra.mxu1 %v540_v0  ;;  %v532_v2 = vld [vmem:[#allocation5 + $0x38] sm:$0xff]  ;;  %v531_v3 = vld [vmem:[#allocation5 + $0x30] sm:$0xff]  ;;  %v538_v4 = vld [vmem:[#allocation7 + $0x28] sm:$0xff]  ;;  %s407_s24 = sshll.u32 %s703_s23, 4  ;;  %s704_s28 = smov 128   ;;  %s408_s24 = int_to_ptr.vmem [resolvable:$true] %s407_s24 }
  0x15   :  { %166 = vmatpush.bf16.msra.mxu0 %v532_v2  ;;  %v530_v5 = vld [vmem:[#allocation5 + $0x28] sm:$0xff]  ;;  %v537_v6 = vld [vmem:[#allocation7 + $0x20] sm:$0xff]  ;;  %v536_v8 = vld [vmem:[#allocation7 + $0x18] sm:$0xff]  ;;  %s705_s29 = smov 8  }
  0x16   :  { %v529_v7 = vld [vmem:[#allocation5 + $0x20] sm:$0xff]  ;;  %v528_v9 = vld [vmem:[#allocation5 + $0x18] sm:$0xff]  ;;  %v535_v10 = vld [vmem:[#allocation7 + $0x10] sm:$0xff] }
  0x17   :  { %v527_v11 = vld [vmem:[#allocation5 + $0x10] sm:$0xff]  ;;  %v534_v12 = vld [vmem:[#allocation7 + $0x8] sm:$0xff]  ;;  %v533_v14 = vld [vmem:[#allocation7] sm:$0xff] }
  0x18   :  { %249 = vmatpush.bf16.msra.mxu1 %v539_v1  ;;  %v526_v13 = vld [vmem:[#allocation5 + $0x8] sm:$0xff]  ;;  %v524_v15 = vld [vmem:[#allocation2] sm:$0xff]  ;;  %v525_v16 = vld [vmem:[#allocation5] sm:$0xff] }
  0x19   :  { %167 = vmatpush.bf16.msra.mxu0 %v531_v3  ;;  %v548_v17 = vld [vmem:[#allocation8 + $0x38] sm:$0xff]  ;;  %v547_v18 = vld [vmem:[#allocation8 + $0x30] sm:$0xff]  ;;  %v546_v23 = vld [vmem:[#allocation8 + $0x28] sm:$0xff] }
  0x1a   :  { %387 = vmatpush.bf16.msra.mxu2 %v548_v17  ;;  %v558_v19 = vld [vmem:[%s793_s4] ss:$0 sm:$0xff]  ;;  %v545_v26 = vld [vmem:[#allocation8 + $0x20] sm:$0xff]  ;;  %v543_v35 = vld [vmem:[#allocation8 + $0x10] sm:$0xff] }
  0x1b   :  { %v544_v32 = vld [vmem:[#allocation8 + $0x18] sm:$0xff]  ;;  %v542_v41 = vld [vmem:[#allocation8 + $0x8] sm:$0xff]  ;;  %v541_v45 = vld [vmem:[#allocation8] sm:$0xff] }
  0x1c   :  { %250 = vmatpush.bf16.msra.mxu1 %v538_v4 }
  0x1d   :  { %168 = vmatpush.bf16.msra.mxu0 %v530_v5 }
  0x1e   :  { %388 = vmatpush.bf16.msra.mxu2 %v547_v18 }
  0x20   :  { %251 = vmatpush.bf16.msra.mxu1 %v537_v6 }
  0x21   :  { %169 = vmatpush.bf16.msra.mxu0 %v529_v7 }
  0x22   :  { %389 = vmatpush.bf16.msra.mxu2 %v546_v23 }
  0x24   :  { %252 = vmatpush.bf16.msra.mxu1 %v536_v8 }
  0x25   :  { %170 = vmatpush.bf16.msra.mxu0 %v528_v9 }
  0x26   :  { %390 = vmatpush.bf16.msra.mxu2 %v545_v26 }
  0x28   :  { %253 = vmatpush.bf16.msra.mxu1 %v535_v10 }
  0x29   :  { %171 = vmatpush.bf16.msra.mxu0 %v527_v11  ;;  %v559_v11 = vld [vmem:[%s792_s3] ss:$0 sm:$0xff] }
  0x2a   :  { %391 = vmatpush.bf16.msra.mxu2 %v544_v32 }
  0x2c   :  { %254 = vmatpush.bf16.msra.mxu1 %v534_v12 }
  0x2d   :  { %172 = vmatpush.bf16.msra.mxu0 %v526_v13 }
  0x2e   :  { %392 = vmatpush.bf16.msra.mxu2 %v543_v35 }
  0x30   :  { %255 = vmatpush.bf16.msra.mxu1 %v533_v14 }
  0x31   :  { %173 = vmatpush.bf16.msra.mxu0 %v525_v16 }
  0x32   :  { %393 = vmatpush.bf16.msra.mxu2 %v542_v41 }
  0x33   :  { %256 = vmatmul.bf16.vlgmr.msra.gmra.mxu1 %v524_v15 }
  0x34   :  { %174 = vmatmul.bf16.vlgmr.msra.gmra.mxu0 %v524_v15 }
  0x36   :  { %394 = vmatpush.bf16.msra.mxu2 %v541_v45 }
  0xb0   :  { %v257_v20 = vpop.f32.mrf.mxu1 }
  0xb1   :  { %v761_v21 = vadd.f32 %v558_v19, %v257_v20  ;;  %v175_v3 = vpop.f32.mrf.mxu0 }
  0xb2   :  { %v176_v18 = vadd.f32 %v559_v11, %v175_v3 }
  0xb3   :  { %v764_v22 = vmul.f32 0.70710677, %v761_v21  ;;  %v262_v14 = vmul.f32 0.5, %v761_v21 }
  0xb5   :  { %vm266_vm0 = vcmp.lt.f32.partialorder %v764_v22, 0.0  ;;  %v268_v24 = vsub.f32 0.0, %v764_v22 }
  0xb7   :  { %v270_v25 = vsel %vm266_vm0, %v268_v24, %v764_v22 }
  0xb8   :  { %v272_v27 = vmul.f32 0.3275911, %v270_v25  ;;  %v259_v28 = vpop.f32.mrf.mxu1  ;;  %v296_v38 = vsub.f32 0.0, %v270_v25 }
  0xb9   :  { %v771_v29 = vadd.f32 %v558_v19, %v259_v28  ;;  %v177_v15 = vpop.f32.mrf.mxu0 }
  0xba   :  { %v274_v30 = vadd.f32 1.0, %v272_v27  ;;  %v298_v43 = vmul.f32 %v296_v38, %v270_v25  ;;  %v178_v22 = vadd.f32 %v559_v11, %v177_v15  ;;  %v560_v27 = vld [vmem:[%s795_s6] ss:$0 sm:$0xff] }
  0xbb   :  { %v265_v31 = vmul.f32 0.70710677, %v771_v29  ;;  %v263_v17 = vmul.f32 0.5, %v771_v29 }
  0xbc   :  { %561 = vrcp.f32 %v274_v30  ;;  %v300_v48 = vmul.f32 1.442695, %v298_v43 }
  0xbd   :  { %vm267_vm1 = vcmp.lt.f32.partialorder %v265_v31, 0.0  ;;  %v269_v33 = vsub.f32 0.0, %v265_v31 }
  0xbf   :  { %v271_v34 = vsel %vm267_vm1, %v269_v33, %v265_v31 }
  0xc0   :  { %v273_v36 = vmul.f32 0.3275911, %v271_v34  ;;  %v297_v49 = vsub.f32 0.0, %v271_v34 }
  0xc2   :  { %v562_v37 = vpop.eup %561  ;;  %v275_v39 = vadd.f32 1.0, %v273_v36  ;;  %v299_v54 = vmul.f32 %v297_v49, %v271_v34 }
  0xc3   :  { %v278_v40 = vmul.f32 1.0614054, %v562_v37 }
  0xc4   :  { %563 = vrcp.f32 %v275_v39  ;;  %v302_v59 = vmul.f32 1.442695, %v299_v54 }
  0xc5   :  { %v280_v42 = vadd.f32 -1.4531521, %v278_v40  ;;  %565 = vpow2.f32 %v300_v48 }
  0xc6   :  { %567 = vpow2.f32 %v302_v59 }
  0xc7   :  { %v282_v44 = vmul.f32 %v562_v37, %v280_v42 }
  0xc9   :  { %v284_v46 = vadd.f32 1.4214138, %v282_v44 }
  0xca   :  { %v564_v47 = vpop.eup %563 }
  0xcb   :  { %v286_v50 = vmul.f32 %v562_v37, %v284_v46  ;;  %v279_v51 = vmul.f32 1.0614054, %v564_v47  ;;  %v566_v62 = vpop.eup %565 }
  0xcc   :  { %v568_v7 = vpop.eup %567 }
  0xcd   :  { %v288_v52 = vadd.f32 -0.28449672, %v286_v50  ;;  %v281_v53 = vadd.f32 -1.4531521, %v279_v51 }
  0xcf   :  { %v290_v55 = vmul.f32 %v562_v37, %v288_v52  ;;  %v283_v56 = vmul.f32 %v564_v47, %v281_v53 }
  0xd1   :  { %v292_v57 = vadd.f32 0.2548296, %v290_v55  ;;  %v285_v58 = vadd.f32 1.4214138, %v283_v56 }
  0xd3   :  { %v294_v60 = vmul.f32 %v562_v37, %v292_v57  ;;  %v287_v61 = vmul.f32 %v564_v47, %v285_v58 }
  0xd5   :  { %v304_v63 = vmul.f32 %v566_v62, %v294_v60  ;;  %v289_v0 = vadd.f32 -0.28449672, %v287_v61 }
  0xd7   :  { %v306_v1 = vsub.f32 1.0, %v304_v63  ;;  %v291_v2 = vmul.f32 %v564_v47, %v289_v0 }
  0xd9   :  { %v308_v4 = vsub.f32 0.0, %v306_v1  ;;  %v293_v5 = vadd.f32 0.2548296, %v291_v2 }
  0xdb   :  { %v295_v6 = vmul.f32 %v564_v47, %v293_v5  ;;  %v310_v8 = vsel %vm266_vm0, %v308_v4, %v306_v1 }
  0xdc   :  { %v312_v12 = vadd.f32 1.0, %v310_v8 }
  0xdd   :  { %v305_v9 = vmul.f32 %v568_v7, %v295_v6 }
  0xde   :  { %v314_v19 = vmul.f32 %v312_v12, %v262_v14 }
  0xdf   :  { %v307_v10 = vsub.f32 1.0, %v305_v9 }
  0xe0   :  { %v316_v24 = vmul.f32 %v314_v19, %v176_v18 }
  0xe1   :  { %v309_v13 = vsub.f32 0.0, %v307_v10 }
  0xe3   :  { %v311_v16 = vsel %vm267_vm1, %v309_v13, %v307_v10 }
  0xe4   :  { %v313_v20 = vadd.f32 1.0, %v311_v16 }
  0xe6   :  { %v315_v23 = vmul.f32 %v313_v20, %v263_v17 }
  0xe8   :  { %v317_v25 = vmul.f32 %v315_v23, %v178_v22 }
  0xea   :  { %v318_v26 = vpack.c.bf16 %v317_v25, %v316_v24 }
  0xec   :  { %395 = vmatmul.bf16.vlgmr.msra.gmra.mxu2 %v318_v26 }
 0x16f   :  { %v396_v28 = vpop.f32.mrf.mxu2 }
 0x170   :  { %v397_v21 = vadd.f32 %v560_v27, %v396_v28 }
 0x172   :  { %401 = vst [vmem:[#allocation10] sm:$0xff] %v397_v21 }
 0x177   :  { %v398_v29 = vpop.f32.mrf.mxu2 }
 0x178   :  { %v399_v30 = vadd.f32 %v560_v27, %v398_v29 }
 0x17a   :  { %402 = vst [vmem:[#allocation10 + $0x8] sm:$0xff] %v399_v30 }
 0x17b   :  { %415 = dma.vmem_to_hbm [thread:$0]  %s408_s24, 256, %s410_s27, [#allocation4], %s704_s28, %s704_s28, %s705_s29  }
 0x17c   :  { %695 = dma.done.wait [#allocation4], 256  }
 0x17d   :  { %696 = vsyncadd [#allocation4], 4294967040 }
 0x17e   :  { %420 = vsyncpa [#allocation3], 1 }
 0x17f   :  { %421 = vsyncpa [#allocation6], 1 }
 0x180   :  { %422 = vsyncpa [#allocation9], 1 }
 0x181   :  { %423 = vsyncpa [#allocation4], 1 }

// kernel: tpu_custom_call.1
= control target key start
LH: loop header
LB: loop body
LE: loop exit
PB: predicated region body
PF: predicated region fallthrough
CT: control target
= control target key end

     0   :  { %12 = vsyncpa [#allocation3], 0  ;;  %s789_s0 = inlined_call_operand.hbm [shape: bf16[16,128], index: 0, kind: input, shape index: {}]   ;;  %s790_s1 = inlined_call_operand.hbm [shape: bf16[128,128], index: 1, kind: input, shape index: {}]   ;;  %s791_s2 = inlined_call_operand.hbm [shape: bf16[128,128], index: 2, kind: input, shape index: {}]   ;;  %s792_s3 = inlined_call_operand.vmem [shape: f32[1,128], index: 3, kind: input, shape index: {}]   ;;  %s793_s4 = inlined_call_operand.vmem [shape: f32[1,128], index: 4, kind: input, shape index: {}]   ;;  %s794_s5 = inlined_call_operand.hbm [shape: bf16[128,128], index: 5, kind: input, shape index: {}]   ;;  %s795_s6 = inlined_call_operand.vmem [shape: f32[1,128], index: 6, kind: input, shape index: {}]   ;;  %s796_s7 = inlined_call_operand.hbm [shape: f32[16,128], index: 7, kind: output, shape index: {}]  }
   0x1   :  { %13 = vsyncpa [#allocation6], 0 }
   0x2   :  { %14 = vsyncpa [#allocation9], 0 }
   0x3   :  { %15 = vsyncpa [#allocation4], 0  ;;  %s33_s26 = sshll.u32 %s790_s1, 4  ;;  %s697_s27 = smov [#allocation5]   ;;  %s34_s26 = int_to_ptr.hbm [resolvable:$true] %s33_s26 }
   0x4   :  { %s35_s28 = sshll.u32 %s697_s27, 4  ;;  %s20_s8 = sshll.u32 %s789_s0, 4  ;;  %s36_s28 = int_to_ptr.vmem [resolvable:$true] %s35_s28  ;;  %s21_s8 = int_to_ptr.hbm [resolvable:$true] %s20_s8 }
   0x5   :  { %s698_s9 = smov 64   ;;  %s699_s10 = smov 4  }
   0x6   :  { %41 = dma.hbm_to_vmem [thread:$0]  %s34_s26, 1024, %s36_s28, [#allocation6], %s698_s9, %s698_s9, %s699_s10  }
   0x7   :  { %s700_s11 = smov [#allocation2]   ;;  %s46_s15 = sshll.u32 %s791_s2, 4  ;;  %s47_s15 = int_to_ptr.hbm [resolvable:$true] %s46_s15 }
   0x8   :  { %s22_s12 = sshll.u32 %s700_s11, 4  ;;  %s63_s17 = sshll.u32 %s794_s5, 4  ;;  %s23_s12 = int_to_ptr.vmem [resolvable:$true] %s22_s12  ;;  %s64_s17 = int_to_ptr.hbm [resolvable:$true] %s63_s17 }
   0x9   :  { %28 = dma.hbm_to_vmem [thread:$0]  %s21_s8, 128, %s23_s12, [#allocation3], %s698_s9, %s698_s9, %s699_s10  }
   0xa   :  { %s701_s18 = smov [#allocation7]   ;;  %s702_s0 = smov [#allocation8]  }
   0xb   :  { %s48_s19 = sshll.u32 %s701_s18, 4  ;;  %s65_s20 = sshll.u32 %s702_s0, 4  ;;  %s49_s19 = int_to_ptr.vmem [resolvable:$true] %s48_s19  ;;  %s66_s20 = int_to_ptr.vmem [resolvable:$true] %s65_s20 }
   0xc   :  { %54 = dma.hbm_to_vmem [thread:$0]  %s47_s15, 1024, %s49_s19, [#allocation6], %s698_s9, %s698_s9, %s699_s10  }
   0xd   :  { %71 = dma.hbm_to_vmem [thread:$0]  %s64_s17, 1024, %s66_s20, [#allocation9], %s698_s9, %s698_s9, %s699_s10  }
   0xe   :  { %689 = dma.done.wait [#allocation3], 128  }
   0xf   :  { %690 = vsyncadd [#allocation3], 4294967168 }
  0x10   :  { %691 = dma.done.wait [#allocation6], 2048  }
  0x11   :  { %692 = vsyncadd [#allocation6], 4294965248 }
  0x12   :  { %693 = dma.done.wait [#allocation9], 1024  }
  0x13   :  { %694 = vsyncadd [#allocation9], 4294966272  ;;  %v540_v0 = vld [vmem:[#allocation7 + $0x38] sm:$0xff]  ;;  %v539_v1 = vld [vmem:[#allocation7 + $0x30] sm:$0xff]  ;;  %s703_s23 = smov [#allocation10]   ;;  %s409_s27 = sshll.u32 %s796_s7, 4  ;;  %s410_s27 = int_to_ptr.hbm [resolvable:$true] %s409_s27 }
  0x14   :  { %248 = vmatpush.bf16.msra.mxu1 %v540_v0  ;;  %v532_v2 = vld [vmem:[#allocation5 + $0x38] sm:$0xff]  ;;  %v531_v3 = vld [vmem:[#allocation5 + $0x30] sm:$0xff]  ;;  %v538_v4 = vld [vmem:[#allocation7 + $0x28] sm:$0xff]  ;;  %s407_s24 = sshll.u32 %s703_s23, 4  ;;  %s704_s28 = smov 128   ;;  %s408_s24 = int_to_ptr.vmem [resolvable:$true] %s407_s24 }
  0x15   :  { %166 = vmatpush.bf16.msra.mxu0 %v532_v2  ;;  %v530_v5 = vld [vmem:[#allocation5 + $0x28] sm:$0xff]  ;;  %v537_v6 = vld [vmem:[#allocation7 + $0x20] sm:$0xff]  ;;  %v536_v8 = vld [vmem:[#allocation7 + $0x18] sm:$0xff]  ;;  %s705_s29 = smov 8  }
  0x16   :  { %v529_v7 = vld [vmem:[#allocation5 + $0x20] sm:$0xff]  ;;  %v528_v9 = vld [vmem:[#allocation5 + $0x18] sm:$0xff]  ;;  %v535_v10 = vld [vmem:[#allocation7 + $0x10] sm:$0xff] }
  0x17   :  { %v527_v11 = vld [vmem:[#allocation5 + $0x10] sm:$0xff]  ;;  %v534_v12 = vld [vmem:[#allocation7 + $0x8] sm:$0xff]  ;;  %v533_v14 = vld [vmem:[#allocation7] sm:$0xff] }
  0x18   :  { %249 = vmatpush.bf16.msra.mxu1 %v539_v1  ;;  %v526_v13 = vld [vmem:[#allocation5 + $0x8] sm:$0xff]  ;;  %v524_v15 = vld [vmem:[#allocation2] sm:$0xff]  ;;  %v525_v16 = vld [vmem:[#allocation5] sm:$0xff] }
  0x19   :  { %167 = vmatpush.bf16.msra.mxu0 %v531_v3  ;;  %v548_v17 = vld [vmem:[#allocation8 + $0x38] sm:$0xff]  ;;  %v547_v18 = vld [vmem:[#allocation8 + $0x30] sm:$0xff]  ;;  %v546_v23 = vld [vmem:[#allocation8 + $0x28] sm:$0xff] }
  0x1a   :  { %387 = vmatpush.bf16.msra.mxu2 %v548_v17  ;;  %v558_v19 = vld [vmem:[%s793_s4] ss:$0 sm:$0xff]  ;;  %v545_v26 = vld [vmem:[#allocation8 + $0x20] sm:$0xff]  ;;  %v543_v35 = vld [vmem:[#allocation8 + $0x10] sm:$0xff] }
  0x1b   :  { %v544_v32 = vld [vmem:[#allocation8 + $0x18] sm:$0xff]  ;;  %v542_v41 = vld [vmem:[#allocation8 + $0x8] sm:$0xff]  ;;  %v541_v45 = vld [vmem:[#allocation8] sm:$0xff] }
  0x1c   :  { %250 = vmatpush.bf16.msra.mxu1 %v538_v4 }
  0x1d   :  { %168 = vmatpush.bf16.msra.mxu0 %v530_v5 }
  0x1e   :  { %388 = vmatpush.bf16.msra.mxu2 %v547_v18 }
  0x20   :  { %251 = vmatpush.bf16.msra.mxu1 %v537_v6 }
  0x21   :  { %169 = vmatpush.bf16.msra.mxu0 %v529_v7 }
  0x22   :  { %389 = vmatpush.bf16.msra.mxu2 %v546_v23 }
  0x24   :  { %252 = vmatpush.bf16.msra.mxu1 %v536_v8 }
  0x25   :  { %170 = vmatpush.bf16.msra.mxu0 %v528_v9 }
  0x26   :  { %390 = vmatpush.bf16.msra.mxu2 %v545_v26 }
  0x28   :  { %253 = vmatpush.bf16.msra.mxu1 %v535_v10 }
  0x29   :  { %171 = vmatpush.bf16.msra.mxu0 %v527_v11  ;;  %v559_v11 = vld [vmem:[%s792_s3] ss:$0 sm:$0xff] }
  0x2a   :  { %391 = vmatpush.bf16.msra.mxu2 %v544_v32 }
  0x2c   :  { %254 = vmatpush.bf16.msra.mxu1 %v534_v12 }
  0x2d   :  { %172 = vmatpush.bf16.msra.mxu0 %v526_v13 }
  0x2e   :  { %392 = vmatpush.bf16.msra.mxu2 %v543_v35 }
  0x30   :  { %255 = vmatpush.bf16.msra.mxu1 %v533_v14 }
  0x31   :  { %173 = vmatpush.bf16.msra.mxu0 %v525_v16 }
  0x32   :  { %393 = vmatpush.bf16.msra.mxu2 %v542_v41 }
  0x33   :  { %256 = vmatmul.bf16.vlgmr.msra.gmra.mxu1 %v524_v15 }
  0x34   :  { %174 = vmatmul.bf16.vlgmr.msra.gmra.mxu0 %v524_v15 }
  0x36   :  { %394 = vmatpush.bf16.msra.mxu2 %v541_v45 }
  0xb0   :  { %v257_v20 = vpop.f32.mrf.mxu1 }
  0xb1   :  { %v761_v21 = vadd.f32 %v558_v19, %v257_v20  ;;  %v175_v3 = vpop.f32.mrf.mxu0 }
  0xb2   :  { %v176_v18 = vadd.f32 %v559_v11, %v175_v3 }
  0xb3   :  { %v764_v22 = vmul.f32 0.70710677, %v761_v21  ;;  %v262_v14 = vmul.f32 0.5, %v761_v21 }
  0xb5   :  { %vm266_vm0 = vcmp.lt.f32.partialorder %v764_v22, 0.0  ;;  %v268_v24 = vsub.f32 0.0, %v764_v22 }
  0xb7   :  { %v270_v25 = vsel %vm266_vm0, %v268_v24, %v764_v22 }
  0xb8   :  { %v272_v27 = vmul.f32 0.3275911, %v270_v25  ;;  %v259_v28 = vpop.f32.mrf.mxu1  ;;  %v296_v38 = vsub.f32 0.0, %v270_v25 }
  0xb9   :  { %v771_v29 = vadd.f32 %v558_v19, %v259_v28  ;;  %v177_v15 = vpop.f32.mrf.mxu0 }
  0xba   :  { %v274_v30 = vadd.f32 1.0, %v272_v27  ;;  %v298_v43 = vmul.f32 %v296_v38, %v270_v25  ;;  %v178_v22 = vadd.f32 %v559_v11, %v177_v15  ;;  %v560_v27 = vld [vmem:[%s795_s6] ss:$0 sm:$0xff] }
  0xbb   :  { %v265_v31 = vmul.f32 0.70710677, %v771_v29  ;;  %v263_v17 = vmul.f32 0.5, %v771_v29 }
  0xbc   :  { %561 = vrcp.f32 %v274_v30  ;;  %v300_v48 = vmul.f32 1.442695, %v298_v43 }
  0xbd   :  { %vm267_vm1 = vcmp.lt.f32.partialorder %v265_v31, 0.0  ;;  %v269_v33 = vsub.f32 0.0, %v265_v31 }
  0xbf   :  { %v271_v34 = vsel %vm267_vm1, %v269_v33, %v265_v31 }
  0xc0   :  { %v273_v36 = vmul.f32 0.3275911, %v271_v34  ;;  %v297_v49 = vsub.f32 0.0, %v271_v34 }
  0xc2   :  { %v562_v37 = vpop.eup %561  ;;  %v275_v39 = vadd.f32 1.0, %v273_v36  ;;  %v299_v54 = vmul.f32 %v297_v49, %v271_v34 }
  0xc3   :  { %v278_v40 = vmul.f32 1.0614054, %v562_v37 }
  0xc4   :  { %563 = vrcp.f32 %v275_v39  ;;  %v302_v59 = vmul.f32 1.442695, %v299_v54 }
  0xc5   :  { %v280_v42 = vadd.f32 -1.4531521, %v278_v40  ;;  %565 = vpow2.f32 %v300_v48 }
  0xc6   :  { %567 = vpow2.f32 %v302_v59 }
  0xc7   :  { %v282_v44 = vmul.f32 %v562_v37, %v280_v42 }
  0xc9   :  { %v284_v46 = vadd.f32 1.4214138, %v282_v44 }
  0xca   :  { %v564_v47 = vpop.eup %563 }
  0xcb   :  { %v286_v50 = vmul.f32 %v562_v37, %v284_v46  ;;  %v279_v51 = vmul.f32 1.0614054, %v564_v47  ;;  %v566_v62 = vpop.eup %565 }
  0xcc   :  { %v568_v7 = vpop.eup %567 }
  0xcd   :  { %v288_v52 = vadd.f32 -0.28449672, %v286_v50  ;;  %v281_v53 = vadd.f32 -1.4531521, %v279_v51 }
  0xcf   :  { %v290_v55 = vmul.f32 %v562_v37, %v288_v52  ;;  %v283_v56 = vmul.f32 %v564_v47, %v281_v53 }
  0xd1   :  { %v292_v57 = vadd.f32 0.2548296, %v290_v55  ;;  %v285_v58 = vadd.f32 1.4214138, %v283_v56 }
  0xd3   :  { %v294_v60 = vmul.f32 %v562_v37, %v292_v57  ;;  %v287_v61 = vmul.f32 %v564_v47, %v285_v58 }
  0xd5   :  { %v304_v63 = vmul.f32 %v566_v62, %v294_v60  ;;  %v289_v0 = vadd.f32 -0.28449672, %v287_v61 }
  0xd7   :  { %v306_v1 = vsub.f32 1.0, %v304_v63  ;;  %v291_v2 = vmul.f32 %v564_v47, %v289_v0 }
  0xd9   :  { %v308_v4 = vsub.f32 0.0, %v306_v1  ;;  %v293_v5 = vadd.f32 0.2548296, %v291_v2 }
  0xdb   :  { %v295_v6 = vmul.f32 %v564_v47, %v293_v5  ;;  %v310_v8 = vsel %vm266_vm0, %v308_v4, %v306_v1 }
  0xdc   :  { %v312_v12 = vadd.f32 1.0, %v310_v8 }
  0xdd   :  { %v305_v9 = vmul.f32 %v568_v7, %v295_v6 }
  0xde   :  { %v314_v19 = vmul.f32 %v312_v12, %v262_v14 }
  0xdf   :  { %v307_v10 = vsub.f32 1.0, %v305_v9 }
  0xe0   :  { %v316_v24 = vmul.f32 %v314_v19, %v176_v18 }
  0xe1   :  { %v309_v13 = vsub.f32 0.0, %v307_v10 }
  0xe3   :  { %v311_v16 = vsel %vm267_vm1, %v309_v13, %v307_v10 }
  0xe4   :  { %v313_v20 = vadd.f32 1.0, %v311_v16 }
  0xe6   :  { %v315_v23 = vmul.f32 %v313_v20, %v263_v17 }
  0xe8   :  { %v317_v25 = vmul.f32 %v315_v23, %v178_v22 }
  0xea   :  { %v318_v26 = vpack.c.bf16 %v317_v25, %v316_v24 }
  0xec   :  { %395 = vmatmul.bf16.vlgmr.msra.gmra.mxu2 %v318_v26 }
 0x16f   :  { %v396_v28 = vpop.f32.mrf.mxu2 }
 0x170   :  { %v397_v21 = vadd.f32 %v560_v27, %v396_v28 }
 0x172   :  { %401 = vst [vmem:[#allocation10] sm:$0xff] %v397_v21 }
 0x177   :  { %v398_v29 = vpop.f32.mrf.mxu2 }
 0x178   :  { %v399_v30 = vadd.f32 %v560_v27, %v398_v29 }
 0x17a   :  { %402 = vst [vmem:[#allocation10 + $0x8] sm:$0xff] %v399_v30 }
 0x17b   :  { %415 = dma.vmem_to_hbm [thread:$0]  %s408_s24, 256, %s410_s27, [#allocation4], %s704_s28, %s704_s28, %s705_s29  }
 0x17c   :  { %695 = dma.done.wait [#allocation4], 256  }
 0x17d   :  { %696 = vsyncadd [#allocation4], 4294967040 }
 0x17e   :  { %420 = vsyncpa [#allocation3], 1 }
 0x17f   :  { %421 = vsyncpa [#allocation6], 1 }
 0x180   :  { %422 = vsyncpa [#allocation9], 1 }
 0x181   :  { %423 = vsyncpa [#allocation4], 1 }

</bundles_post_ra>
